<compile_context>
chip_gen: v7x
topology: tpu7x:2x2x1
jax: 0.10.0
libtpu: 0.0.40
codegen_flags: <defaults>
</compile_context>

<pallas_src>
import functools

import jax
import jax.numpy as jnp
from jax.experimental import pallas as pl
from jax.experimental.pallas import tpu as pltpu


def _round_up(x, m):
    return ((x + m - 1) // m) * m


def _full_spec(shape):
    # Constant-index block: DMA'd once, stays VMEM resident across the grid.
    return pl.BlockSpec(shape, lambda *_: (0,) * len(shape))


def _epilogue(x, g_ref, beta_ref, w1row_ref, b1_ref, pm_ref, out_ref, eps):
    # x: (tn, H) float32 pre-activation.
    x = jnp.tanh(x)                                   # EUP
    # One-pass LayerNorm: E[x] and E[x^2] in a single sweep; tanh output is bounded
    # in [-1, 1] so the cancellation is benign; clamp var at 0 for f32 rounding.
    mu = jnp.mean(x, axis=-1, keepdims=True)
    ex2 = jnp.mean(x * x, axis=-1, keepdims=True)
    var = jnp.maximum(ex2 - mu * mu, 0.0)
    x = (x - mu) * jax.lax.rsqrt(var + eps)
    x = x * g_ref[...] + beta_ref[...]
    # dense_1 as VPU multiply + lane reduction: a (tn,H)@(H,1) matmul would occupy
    # the MXU pipeline for a single useful output column.
    logits = jnp.sum(x * w1row_ref[...], axis=-1, keepdims=True) + b1_ref[...]
    pm = pm_ref[...]
    out_ref[...] = (logits * (1.0 - pm) - 1e30 * pm).astype(out_ref.dtype)


def _kernel_positions(eps, h_ref, sc_ref, pm_ref, w0h_ref,
                      g_ref, beta_ref, w1row_ref, b1_ref, out_ref):
    # Start contribution (ss @ W0s + b0) precomputed per batch in the wrapper:
    # one MXU matmul per tile, no (B, S, H) start_states broadcast streamed.
    x = jnp.dot(h_ref[...], w0h_ref[...], preferred_element_type=jnp.float32)
    x = x + sc_ref[0].astype(jnp.float32)             # (1, H) broadcast over rows
    _epilogue(x, g_ref, beta_ref, w1row_ref, b1_ref, pm_ref, out_ref, eps)


def _kernel_states(eps, h_ref, s_ref, pm_ref, w0h_ref, w0s_ref, b0_ref,
                   g_ref, beta_ref, w1row_ref, b1_ref, out_ref):
    # General path: full per-row start_states are streamed (split-weight concat).
    x = (jnp.dot(h_ref[...], w0h_ref[...], preferred_element_type=jnp.float32)
         + jnp.dot(s_ref[...], w0s_ref[...], preferred_element_type=jnp.float32)
         + b0_ref[...])
    _epilogue(x, g_ref, beta_ref, w1row_ref, b1_ref, pm_ref, out_ref, eps)


@functools.partial(jax.jit, static_argnames=("eps", "tn", "stream_dtype"))
def pooler_end_logits(hidden_states, params, start_states=None,
                      start_positions=None, p_mask=None, *,
                      eps=1e-12, tn=512, stream_dtype=None):
    """hidden_states: (B, S, H) -> end logits (B, S).

    params (weights pre-transposed to (in, out)):
      w0h, w0s : (H, H) dense_0 weight halves   b0 : (1, H)
      gamma, beta : (1, H) LayerNorm affine
      w1 : (H, 1)   b1 : (1, 1)
    stream_dtype: dtype used to stream activations / matmul weights (e.g. bf16);
      accumulation and LayerNorm math stay f32.
    """
    B, S, H = hidden_states.shape
    f32 = jnp.float32
    sdt = jnp.dtype(stream_dtype) if stream_dtype is not None else hidden_states.dtype
    out_dtype = hidden_states.dtype

    use_positions = start_positions is not None
    assert use_positions or start_states is not None, \
        "need start_states or start_positions"

    if p_mask is None:
        p_mask = jnp.zeros((B, S), f32)
    p_mask = p_mask.astype(f32)

    # --- row tiling: tiles never straddle a batch; pad S up to a tile multiple ---
    tn_eff = int(min(tn, _round_up(S, 8)))
    S_pad = _round_up(S, tn_eff)
    S_tiles = S_pad // tn_eff
    # v7x has 2 TensorCores: make sure a parallel grid has >= 2 steps when possible.
    if B * S_tiles < 2 and S > 8:
        tn_eff = _round_up((S + 1) // 2, 8)
        S_pad = _round_up(S, tn_eff)
        S_tiles = S_pad // tn_eff

    hp, pm = hidden_states, p_mask
    if S_pad != S:
        hp = jnp.pad(hp, ((0, 0), (0, S_pad - S), (0, 0)))
        pm = jnp.pad(pm, ((0, 0), (0, S_pad - S)))
    h2d = hp.reshape(B * S_pad, H).astype(sdt)
    pm2d = pm.reshape(B * S_pad, 1)
    Np = B * S_pad

    w0h = params["w0h"].astype(sdt)
    gamma = params["gamma"].astype(f32)
    beta = params["beta"].astype(f32)
    w1row = params["w1"].reshape(1, H).astype(f32)
    b1 = params["b1"].reshape(1, 1).astype(f32)

    row_spec = pl.BlockSpec((tn_eff, H), lambda b, i: (b * S_tiles + i, 0))
    col_spec = pl.BlockSpec((tn_eff, 1), lambda b, i: (b * S_tiles + i, 0))

    if use_positions:
        # Gather the start row per batch, fold dense_0's "start half" + bias into a
        # per-batch (1, H) contribution in the wrapper (tiny (B,H)@(H,H) in XLA).
        pos = jnp.broadcast_to(start_positions.reshape(B, 1, 1).astype(jnp.int32),
                               (B, 1, H))
        ss = jnp.take_along_axis(hidden_states, pos, axis=1)[:, 0, :]      # (B, H)
        sc = (ss.astype(f32) @ params["w0s"].astype(f32)
              + params["b0"].astype(f32)).reshape(B, 1, H)
        kernel = functools.partial(_kernel_positions, float(eps))
        inputs = (h2d, sc, pm2d, w0h, gamma, beta, w1row, b1)
        in_specs = [
            row_spec,
            pl.BlockSpec((1, 1, H), lambda b, i: (b, 0, 0)),   # per-batch start contrib
            col_spec,
            _full_spec((H, H)), _full_spec((1, H)), _full_spec((1, H)),
            _full_spec((1, H)), _full_spec((1, 1)),
        ]
        n_mm = 1
    else:
        sp = start_states
        if S_pad != S:
            sp = jnp.pad(sp, ((0, 0), (0, S_pad - S), (0, 0)))
        s2d = sp.reshape(B * S_pad, H).astype(sdt)
        w0s = params["w0s"].astype(sdt)
        b0 = params["b0"].astype(f32)
        kernel = functools.partial(_kernel_states, float(eps))
        inputs = (h2d, s2d, pm2d, w0h, w0s, b0, gamma, beta, w1row, b1)
        in_specs = [
            row_spec, row_spec, col_spec,
            _full_spec((H, H)), _full_spec((H, H)), _full_spec((1, H)),
            _full_spec((1, H)), _full_spec((1, H)), _full_spec((1, H)),
            _full_spec((1, 1)),
        ]
        n_mm = 2

    # VMEM budget: double-buffered row tiles + (double-buffered) resident weights.
    isz = jnp.dtype(sdt).itemsize
    tile_bytes = tn_eff * (n_mm * H * isz + 4 + 4)
    weight_bytes = n_mm * H * H * isz + 6 * H * 4
    vmem_limit = int(min(max(4 * tile_bytes + 2 * weight_bytes + (4 << 20), 32 << 20),
                         64 << 20))

    cost = pl.CostEstimate(
        flops=int(2 * Np * H * H * n_mm + 12 * Np * H),
        transcendentals=int(Np * H + Np),
        bytes_accessed=int(Np * (n_mm * H * isz + 8) + weight_bytes),
    )

    out = pl.pallas_call(
        kernel,
        out_shape=jax.ShapeDtypeStruct((Np, 1), out_dtype),
        grid_spec=pltpu.PrefetchScalarGridSpec(
            num_scalar_prefetch=0,
            grid=(B, S_tiles),
            in_specs=in_specs,
            out_specs=col_spec,
        ),
        compiler_params=pltpu.CompilerParams(
            dimension_semantics=("parallel", "parallel"),
            vmem_limit_bytes=vmem_limit),
        cost_estimate=cost,
    )(*inputs)

    # Padded rows are computed (harmless, no NaN) and sliced off here — keep the slice.
    return out.reshape(B, S_pad)[:, :S]


def _reference(hidden_states, params, start_states=None, start_positions=None,
               p_mask=None, eps=1e-12):
    """Pure-JAX reference of the PyTorch forward pass."""
    B, S, H = hidden_states.shape
    if start_positions is not None:
        pos = jnp.broadcast_to(start_positions[:, None, None].astype(jnp.int32),
                               (B, 1, H))
        ss = jnp.take_along_axis(hidden_states, pos, axis=1)
        start_states = jnp.broadcast_to(ss, (B, S, H))
    x = jnp.concatenate([hidden_states, start_states], axis=-1)
    w0 = jnp.concatenate([params["w0h"], params["w0s"]], axis=0)   # (2H, H)
    x = x @ w0 + params["b0"]
    x = jnp.tanh(x)
    mu = jnp.mean(x, axis=-1, keepdims=True)
    var = jnp.mean((x - mu) ** 2, axis=-1, keepdims=True)
    x = (x - mu) / jnp.sqrt(var + eps)
    x = x * params["gamma"] + params["beta"]
    x = (x @ params["w1"] + params["b1"])[..., 0]
    if p_mask is not None:
        x = x * (1.0 - p_mask) - 1e30 * p_mask
    return x


if __name__ == "__main__":
    # config: hidden_size=32 -> dense_0 is Linear(64, 32), dense_1 is Linear(32, 1)
    B, S, H = 2, 8, 32
    EPS = 1e-12

    key = jax.random.PRNGKey(0)
    ks = jax.random.split(key, 8)
    params = {
        "w0h": 0.05 * jax.random.normal(ks[0], (H, H), jnp.float32),
        "w0s": 0.05 * jax.random.normal(ks[1], (H, H), jnp.float32),
        "b0": 0.01 * jax.random.normal(ks[2], (1, H), jnp.float32),
        "gamma": jnp.ones((1, H), jnp.float32),
        "beta": jnp.zeros((1, H), jnp.float32),
        "w1": 0.05 * jax.random.normal(ks[3], (H, 1), jnp.float32),
        "b1": 0.01 * jax.random.normal(ks[4], (1, 1), jnp.float32),
    }
    hidden_states = jax.random.normal(ks[5], (B, S, H), jnp.float32)
    start_positions = jax.random.randint(ks[6], (B,), 0, S, jnp.int32)
    # mask the first (CLS-like) token of every sequence
    p_mask = jnp.zeros((B, S), jnp.float32).at[:, 0].set(1.0)

    # 1) positions path, f32 streaming — strict check.
    out = pooler_end_logits(hidden_states, params,
                            start_positions=start_positions,
                            p_mask=p_mask, eps=EPS)
    out = jax.block_until_ready(out)
    ref = _reference(hidden_states, params, start_positions=start_positions,
                     p_mask=p_mask, eps=EPS)
    assert out.shape == (B, S), out.shape
    assert jnp.allclose(out, ref, atol=1e-4, rtol=1e-4), \
        float(jnp.max(jnp.abs(out - ref)))

    # 2) positions path, bf16 streaming (halves HBM bytes) — loose check.
    out_bf = pooler_end_logits(hidden_states, params,
                               start_positions=start_positions,
                               p_mask=p_mask, eps=EPS,
                               stream_dtype=jnp.bfloat16)
    out_bf = jax.block_until_ready(out_bf)
    assert jnp.allclose(out_bf, ref, atol=5e-2, rtol=5e-2), \
        float(jnp.max(jnp.abs(out_bf - ref)))

    # 3) explicit start_states path — strict check.
    start_states = jax.random.normal(ks[7], (B, S, H), jnp.float32)
    out_ss = pooler_end_logits(hidden_states, params, start_states=start_states,
                               p_mask=p_mask, eps=EPS)
    out_ss = jax.block_until_ready(out_ss)
    ref_ss = _reference(hidden_states, params, start_states=start_states,
                        p_mask=p_mask, eps=EPS)
    assert jnp.allclose(out_ss, ref_ss, atol=1e-4, rtol=1e-4), \
        float(jnp.max(jnp.abs(out_ss - ref_ss)))

    print("KERNEL_OK")
</pallas_src>

<mosaic_0001>
module attributes {stable_mosaic.version = 11 : i64} {
  func.func @_kernel_positions(%arg0: i32, %arg1: i32, %arg2: memref<8x32xf32, #tpu.memory_space<vmem>>, %arg3: memref<1x1x32xf32, #tpu.memory_space<vmem>>, %arg4: memref<8x1xf32, #tpu.memory_space<vmem>>, %arg5: memref<32x32xf32, #tpu.memory_space<vmem>>, %arg6: memref<1x32xf32, #tpu.memory_space<vmem>>, %arg7: memref<1x32xf32, #tpu.memory_space<vmem>>, %arg8: memref<1x32xf32, #tpu.memory_space<vmem>>, %arg9: memref<1x1xf32, #tpu.memory_space<vmem>>, %arg10: memref<8x1xf32, #tpu.memory_space<vmem>>) attributes {dimension_semantics = [#tpu.dimension_semantics<parallel>, #tpu.dimension_semantics<parallel>], iteration_bounds = array<i64: 2, 1>, scalar_prefetch = 0 : i64, scratch_operands = 0 : i64, tpu.core_type = #tpu.core_type<tc>, window_params = [{transform_indices = @transform_0, window_bounds = array<i64: 8, 32>}, {transform_indices = @transform_1, window_bounds = array<i64: 1, 1, 32>}, {transform_indices = @transform_2, window_bounds = array<i64: 8, 1>}, {pipeline_mode = #tpu.pipeline_mode<synchronous>, transform_indices = @transform_3, window_bounds = array<i64: 32, 32>}, {pipeline_mode = #tpu.pipeline_mode<synchronous>, transform_indices = @transform_4, window_bounds = array<i64: 1, 32>}, {pipeline_mode = #tpu.pipeline_mode<synchronous>, transform_indices = @transform_5, window_bounds = array<i64: 1, 32>}, {pipeline_mode = #tpu.pipeline_mode<synchronous>, transform_indices = @transform_6, window_bounds = array<i64: 1, 32>}, {pipeline_mode = #tpu.pipeline_mode<synchronous>, transform_indices = @transform_7, window_bounds = array<i64: 1, 1>}, {transform_indices = @transform_8, window_bounds = array<i64: 8, 1>}]} {
    %c0 = arith.constant 0 : index
    %c0_0 = arith.constant 0 : index
    %0 = vector.load %arg2[%c0, %c0_0] : memref<8x32xf32, #tpu.memory_space<vmem>>, vector<8x32xf32>
    %c0_1 = arith.constant 0 : index
    %c0_2 = arith.constant 0 : index
    %1 = vector.load %arg5[%c0_1, %c0_2] : memref<32x32xf32, #tpu.memory_space<vmem>>, vector<32x32xf32>
    %cst = arith.constant dense<0.000000e+00> : vector<8x32xf32>
    %2 = tpu.matmul %0, %1, %cst {dimension_numbers = #tpu.dot_dimension_numbers<[1], [0], [0], [1], [0, 0, 1, 1], [], []>} : vector<8x32xf32>, vector<32x32xf32>, vector<8x32xf32> -> vector<8x32xf32>
    %c0_3 = arith.constant 0 : index
    %c0_4 = arith.constant 0 : index
    %c0_5 = arith.constant 0 : index
    %3 = vector.load %arg3[%c0_3, %c0_4, %c0_5] : memref<1x1x32xf32, #tpu.memory_space<vmem>>, vector<1x1x32xf32>
    %4 = vector.shape_cast %3 : vector<1x1x32xf32> to vector<1x32xf32>
    %5 = vector.broadcast %4 : vector<1x32xf32> to vector<8x32xf32>
    %6 = arith.addf %2, %5 : vector<8x32xf32>
    %7 = math.tanh %6 : vector<8x32xf32>
    %cst_6 = arith.constant dense<0.000000e+00> : vector<8xf32>
    %8 = vector.multi_reduction <add>, %7, %cst_6 [1] : vector<8x32xf32> to vector<8xf32>
    %9 = vector.shape_cast %8 : vector<8xf32> to vector<8x1xf32>
    %cst_7 = arith.constant 3.200000e+01 : f32
    %10 = vector.broadcast %cst_7 : f32 to vector<8x1xf32>
    %11 = arith.divf %9, %10 : vector<8x1xf32>
    %12 = arith.mulf %7, %7 : vector<8x32xf32>
    %cst_8 = arith.constant dense<0.000000e+00> : vector<8xf32>
    %13 = vector.multi_reduction <add>, %12, %cst_8 [1] : vector<8x32xf32> to vector<8xf32>
    %14 = vector.shape_cast %13 : vector<8xf32> to vector<8x1xf32>
    %cst_9 = arith.constant 3.200000e+01 : f32
    %15 = vector.broadcast %cst_9 : f32 to vector<8x1xf32>
    %16 = arith.divf %14, %15 : vector<8x1xf32>
    %17 = arith.mulf %11, %11 : vector<8x1xf32>
    %18 = arith.subf %16, %17 : vector<8x1xf32>
    %cst_10 = arith.constant 0.000000e+00 : f32
    %19 = vector.broadcast %cst_10 : f32 to vector<8x1xf32>
    %20 = arith.maximumf %18, %19 : vector<8x1xf32>
    %21 = vector.broadcast %11 : vector<8x1xf32> to vector<8x32xf32>
    %22 = arith.subf %7, %21 : vector<8x32xf32>
    %cst_11 = arith.constant 9.99999996E-13 : f32
    %23 = vector.broadcast %cst_11 : f32 to vector<8x1xf32>
    %24 = arith.addf %20, %23 : vector<8x1xf32>
    %25 = math.rsqrt %24 : vector<8x1xf32>
    %26 = vector.broadcast %25 : vector<8x1xf32> to vector<8x32xf32>
    %27 = arith.mulf %22, %26 : vector<8x32xf32>
    %c0_12 = arith.constant 0 : index
    %c0_13 = arith.constant 0 : index
    %28 = vector.load %arg6[%c0_12, %c0_13] : memref<1x32xf32, #tpu.memory_space<vmem>>, vector<1x32xf32>
    %29 = vector.broadcast %28 : vector<1x32xf32> to vector<8x32xf32>
    %30 = arith.mulf %27, %29 : vector<8x32xf32>
    %c0_14 = arith.constant 0 : index
    %c0_15 = arith.constant 0 : index
    %31 = vector.load %arg7[%c0_14, %c0_15] : memref<1x32xf32, #tpu.memory_space<vmem>>, vector<1x32xf32>
    %32 = vector.broadcast %31 : vector<1x32xf32> to vector<8x32xf32>
    %33 = arith.addf %30, %32 : vector<8x32xf32>
    %c0_16 = arith.constant 0 : index
    %c0_17 = arith.constant 0 : index
    %34 = vector.load %arg8[%c0_16, %c0_17] : memref<1x32xf32, #tpu.memory_space<vmem>>, vector<1x32xf32>
    %35 = vector.broadcast %34 : vector<1x32xf32> to vector<8x32xf32>
    %36 = arith.mulf %33, %35 : vector<8x32xf32>
    %cst_18 = arith.constant dense<0.000000e+00> : vector<8xf32>
    %37 = vector.multi_reduction <add>, %36, %cst_18 [1] : vector<8x32xf32> to vector<8xf32>
    %38 = vector.shape_cast %37 : vector<8xf32> to vector<8x1xf32>
    %c0_19 = arith.constant 0 : index
    %c0_20 = arith.constant 0 : index
    %39 = vector.load %arg9[%c0_19, %c0_20] : memref<1x1xf32, #tpu.memory_space<vmem>>, vector<1x1xf32>
    %40 = vector.broadcast %39 : vector<1x1xf32> to vector<8x1xf32>
    %41 = arith.addf %38, %40 : vector<8x1xf32>
    %c0_21 = arith.constant 0 : index
    %c0_22 = arith.constant 0 : index
    %42 = vector.load %arg4[%c0_21, %c0_22] : memref<8x1xf32, #tpu.memory_space<vmem>>, vector<8x1xf32>
    %cst_23 = arith.constant 1.000000e+00 : f32
    %43 = vector.broadcast %cst_23 : f32 to vector<8x1xf32>
    %44 = arith.subf %43, %42 : vector<8x1xf32>
    %45 = arith.mulf %41, %44 : vector<8x1xf32>
    %cst_24 = arith.constant 1.000000e+30 : f32
    %46 = vector.broadcast %cst_24 : f32 to vector<8x1xf32>
    %47 = arith.mulf %46, %42 : vector<8x1xf32>
    %48 = arith.subf %45, %47 : vector<8x1xf32>
    %c0_25 = arith.constant 0 : index
    %c0_26 = arith.constant 0 : index
    %49 = vector.load %arg10[%c0_25, %c0_26] : memref<8x1xf32, #tpu.memory_space<vmem>>, vector<8x1xf32>
    tpu.vector_store %arg10[%c0_25, %c0_26], %48 {strides = array<i32>} : memref<8x1xf32, #tpu.memory_space<vmem>>, vector<8x1xf32>,
    return
  }
  func.func @transform_0(%arg0: i32, %arg1: i32) -> (i32, i32) {
    %c1_i32 = arith.constant 1 : i32
    %0 = arith.muli %arg0, %c1_i32 : i32
    %1 = arith.addi %0, %arg1 : i32
    %c0_i32 = arith.constant 0 : i32
    %c0_i32_0 = arith.constant 0 : i32
    return %1, %c0_i32 : i32, i32
  }
  func.func @transform_1(%arg0: i32, %arg1: i32) -> (i32, i32, i32) {
    %c0_i32 = arith.constant 0 : i32
    %c0_i32_0 = arith.constant 0 : i32
    %c0_i32_1 = arith.constant 0 : i32
    return %arg0, %c0_i32, %c0_i32_0 : i32, i32, i32
  }
  func.func @transform_2(%arg0: i32, %arg1: i32) -> (i32, i32) {
    %c1_i32 = arith.constant 1 : i32
    %0 = arith.muli %arg0, %c1_i32 : i32
    %1 = arith.addi %0, %arg1 : i32
    %c0_i32 = arith.constant 0 : i32
    %c0_i32_0 = arith.constant 0 : i32
    return %1, %c0_i32 : i32, i32
  }
  func.func @transform_3(%arg0: i32, %arg1: i32) -> (i32, i32) {
    %c0_i32 = arith.constant 0 : i32
    %c0_i32_0 = arith.constant 0 : i32
    %c0_i32_1 = arith.constant 0 : i32
    return %c0_i32, %c0_i32_0 : i32, i32
  }
  func.func @transform_4(%arg0: i32, %arg1: i32) -> (i32, i32) {
    %c0_i32 = arith.constant 0 : i32
    %c0_i32_0 = arith.constant 0 : i32
    %c0_i32_1 = arith.constant 0 : i32
    return %c0_i32, %c0_i32_0 : i32, i32
  }
  func.func @transform_5(%arg0: i32, %arg1: i32) -> (i32, i32) {
    %c0_i32 = arith.constant 0 : i32
    %c0_i32_0 = arith.constant 0 : i32
    %c0_i32_1 = arith.constant 0 : i32
    return %c0_i32, %c0_i32_0 : i32, i32
  }
  func.func @transform_6(%arg0: i32, %arg1: i32) -> (i32, i32) {
    %c0_i32 = arith.constant 0 : i32
    %c0_i32_0 = arith.constant 0 : i32
    %c0_i32_1 = arith.constant 0 : i32
    return %c0_i32, %c0_i32_0 : i32, i32
  }
  func.func @transform_7(%arg0: i32, %arg1: i32) -> (i32, i32) {
    %c0_i32 = arith.constant 0 : i32
    %c0_i32_0 = arith.constant 0 : i32
    %c0_i32_1 = arith.constant 0 : i32
    return %c0_i32, %c0_i32_0 : i32, i32
  }
  func.func @transform_8(%arg0: i32, %arg1: i32) -> (i32, i32) {
    %c1_i32 = arith.constant 1 : i32
    %0 = arith.muli %arg0, %c1_i32 : i32
    %1 = arith.addi %0, %arg1 : i32
    %c0_i32 = arith.constant 0 : i32
    %c0_i32_0 = arith.constant 0 : i32
    return %1, %c0_i32 : i32, i32
  }
}

</mosaic_0001>

<bundles_post_ra>
// kernel: pooler_end_logits.1
= control target key start
LH: loop header
LB: loop body
LE: loop exit
PB: predicated region body
PF: predicated region fallthrough
CT: control target
= control target key end

     0   :  { %s741_s29 = smov 0   ;;  %s743_s30 = smov 0   ;;  %s810_s0 = inlined_call_operand.vmem [shape: f32[16,32], index: 0, kind: input, shape index: {}]   ;;  %s811_s1 = inlined_call_operand.vmem [shape: f32[2,1,32], index: 1, kind: input, shape index: {}]   ;;  %s812_s2 = inlined_call_operand.vmem [shape: f32[16,1], index: 2, kind: input, shape index: {}]   ;;  %s813_s3 = inlined_call_operand.vmem [shape: f32[32,32], index: 3, kind: input, shape index: {}]   ;;  %s814_s4 = inlined_call_operand.vmem [shape: f32[1,32], index: 4, kind: input, shape index: {}]   ;;  %s815_s5 = inlined_call_operand.vmem [shape: f32[1,32], index: 5, kind: input, shape index: {}]   ;;  %s816_s6 = inlined_call_operand.vmem [shape: f32[1,32], index: 6, kind: input, shape index: {}]   ;;  %s817_s7 = inlined_call_operand.<no memory space> [shape: f32[1,1], index: 7, kind: input, shape index: {}]   ;;  %s818_s8 = inlined_call_operand.vmem [shape: f32[16,1], index: 8, kind: output, shape index: {}]  }
   0x1   :  { %v13_v0 = vstv %s817_s7  ;;  %s745_s9 = smov 0  }
   0x2   :  { %14 = vst [vmem:[#allocation2] sm:$0x1] %v13_v0 }
   0x3 LB: > { %s32_s7 = sadd.s32 1, %s684_s30  ;;  %p601_p0 = scmp.ge.s32.totalorder %s688_s9, 1  ;;  %s688_s9 = sphi %s745_s9, %s20_s9   ;;  %s684_s30 = sphi %s743_s30, %s820_s30   ;;  %s680_s29 = sphi %s741_s29, %s819_s29  }
   0x4   : > { %p34_p1 = scmp.ge.s32.totalorder %s32_s7, 2  ;;  %p302_p2 = scmp.lt.s32.totalorder %s688_s9, 3 }
   0x6   : > { %s822_s7 = smov (%p34_p1, %s32_s7), 0  ;;  %p303_p3 = pnand %p601_p0, %p302_p2 }
   0x7   : > { %v366_v1 = vld [vmem:[%s813_s3] sm:$0xff] (!%p303_p3)  ;;  %v367_v2 = vld [vmem:[%s813_s3 + $0x8] sm:$0xff] (!%p303_p3)  ;;  %v368_v3 = vld [vmem:[%s813_s3 + $0x10] sm:$0xff] (!%p303_p3)  ;;  %v690_v4 = vmov (!%p303_p3), 0.0|0.0   ;;  %vm691_vm0 = vmmov (!%p303_p3), 0   ;;  %v692_v7 = vmov (!%p303_p3), 0.0  }
   0x8   : > { %306 = sbr.rel (%p303_p3) target bundleno = 568 (0x238), region = 52  ;;  %629 = vmatprep.subr.bf16.mxu0 (!%p303_p3), %v690_v4  ;;  %v630_v5 = vpack.c.bf16 (!%p303_p3), %v367_v2, %v366_v1  ;;  %v369_v6 = vld [vmem:[%s813_s3 + $0x18] sm:$0xff] (!%p303_p3)  ;;  %626 = vmatprep.mubr.msk.f32.mxu0 (!%p303_p3), %vm691_vm0, %v692_v7  ;;  %p345_p4 = scmp.lt.s32.totalorder (!%p303_p3), %s680_s29, 1  ;;  %vm377_vm1 = vcmask (!%p303_p3), 261120   ;;  %v607_v28 = vld [vmem:[%s814_s4] ss:$0 sm:$0xff] (!%p303_p3) }
   0x9   : > { %v633_v8 = vpack.c.bf16 (!%p303_p3), %v369_v6, %v368_v3  ;;  %v608_v30 = vld [vmem:[%s815_s5] ss:$0 sm:$0xff] (!%p303_p3)  ;;  %vm509_vm2 = vcmask (!%p303_p3), 7168  }
   0xa   : > { %631 = vmatpush3.bf16.msra.mxu0 (!%p303_p3), %v630_v5  ;;  %v609_v32 = vld [vmem:[%s816_s6] ss:$0 sm:$0xff] (!%p303_p3) }
   0xb   : > { %632 = vmatprep.subr.bf16.mxu0 (!%p303_p3), %v690_v4  ;;  %v610_v37 = vld [vmem:[#allocation2] ss:$0 sm:$0xff] (!%p303_p3) }
   0xe   : > { %634 = vmatpush3.bf16.msra.mxu0 (!%p303_p3), %v633_v8 }
   0xf   : > { %s824_s29 = smov (!%p345_p4, %s680_s29), 1 }
  0x10   : > { %s771_s18 = sshll.u32 %s824_s29, 3  ;;  %s352_s24 = scalar_lea.vmem %s811_s1, %s824_s29 }
  0x11   : > { %s348_s21 = scalar_lea.vmem %s810_s0, %s771_s18  ;;  %v605_v10 = vld [vmem:[%s352_s24] ss:$0 sm:$0xff]  ;;  %s357_s13 = scalar_lea.vmem %s812_s2, %s771_s18 }
  0x12   : > { %v365_v9 = vld [vmem:[%s348_s21] sm:$0xff]  ;;  %s363_s16 = scalar_lea.vmem %s818_s8, %s771_s18 }
  0x13   : > { %627 = vmatmul.mubr.msk.f32.vlgmr.msra.gmra.mrb[0].mxu0 %vm377_vm1, %v365_v9  ;;  %v504_v36 = vld [vmem:[%s357_s13] sm:$0xff] }
  0x14   : > { %v505_v38 = vsub.f32 1.0, %v504_v36  ;;  %v507_v40 = vmul.f32 1e+30, %v504_v36 }
  0xe6   : > { %v447_v11 = vpop.f32.mrb[0].mxu0 }
  0xe7   : > { %v448_v12 = vadd.f32 %v605_v10, %v447_v11  ;;  %v628_v13 = vpop.f32.mrb[1].mxu0 }
  0xe9   : > { %662 = vtanh.f32 %v448_v12 }
  0xf3   : > { %v663_v14 = vpop.eup %662 }
  0xf4   : > { %v452_v15 = vsel %vm377_vm1, %v663_v14, 0.0  ;;  %v457_v16 = vmul.f32 %v663_v14, %v663_v14 }
  0xf5   : > { %453 = vadd.xlane.f32.xlu0 %v452_v15 }
  0xf6   : > { %v458_v17 = vsel %vm377_vm1, %v457_v16, 0.0 }
  0xf9   : > { %459 = vadd.xlane.f32.xlu0 %v458_v17 }
 0x182   : > { %v454_v18 = vpop.xlane.xlu0 %453 }
 0x183   : > { %v456_v19 = vmul.f32 0.03125, %v454_v18 }
 0x185   : > { %v462_v21 = vmul.f32 %v456_v19, %v456_v19  ;;  %v465_v26 = vsub.f32 %v663_v14, %v456_v19 }
 0x186   : > { %v460_v20 = vpop.xlane.xlu0 %459 }
 0x187   : > { %v461_v22 = vmul.f32 0.03125, %v460_v20 }
 0x189   : > { %v463_v23 = vsub.f32 %v461_v22, %v462_v21 }
 0x18b   : > { %v464_v24 = vmax.f32 %v463_v23, 0.0 }
 0x18d   : > { %v466_v25 = vadd.f32 1e-12, %v464_v24 }
 0x18f   : > { %664 = vrsqrt.f32 %v466_v25 }
 0x199   : > { %v665_v27 = vpop.eup %664 }
 0x19a   : > { %v468_v29 = vmul.f32 %v665_v27, %v465_v26 }
 0x19c   : > { %v476_v31 = vmul.f32 %v607_v28, %v468_v29 }
 0x19e   : > { %v484_v33 = vadd.f32 %v608_v30, %v476_v31 }
 0x1a0   : > { %v492_v34 = vmul.f32 %v609_v32, %v484_v33 }
 0x1a2   : > { %v493_v35 = vsel %vm377_vm1, %v492_v34, 0.0 }
 0x1a3   : > { %494 = vadd.xlane.f32.xlu1 %v493_v35 }
 0x230   : > { %v495_v39 = vpop.xlane.xlu1 %494 }
 0x231   : > { %v503_v41 = vadd.f32 %v610_v37, %v495_v39 }
 0x233   : > { %v506_v42 = vmul.f32 %v505_v38, %v503_v41 }
 0x235   : > { %v508_v43 = vsub.f32 %v506_v42, %v507_v40 }
 0x237   : > { %510 = vst.msk [vmem:[%s363_s16] sm:$0xff] %vm509_vm2, %v508_v43 }
 0x238 PF: > { %s20_s9 = sadd.s32 1, %s688_s9   ;;  %s819_s29 = smov %s684_s30 }
 0x239   : > { %p17_p5 = scmp.ge.s32.totalorder %s20_s9, 4   ;;  %s820_s30 = smov %s822_s7 }
 0x23b   :  { %19 = sbr.rel (!%p17_p5) target bundleno = 3 (0x3), region = 88 }

</bundles_post_ra>
